<compile_context>
chip_gen: v7x
topology: tpu7x:2x2x1
jax: 0.10.0
libtpu: 0.0.40
codegen_flags: <defaults>
</compile_context>

<pallas_src>
import functools

import jax
import jax.numpy as jnp
from jax.experimental import pallas as pl
from jax.experimental.pallas import tpu as pltpu


# ----------------------------- Pallas kernel ------------------------------- #

def grouperxyz_kernel(gx_ref, mask_ref, w1_ref, w2_ref, b1_ref, b2_ref, out_ref):
    """SharedMLP (3->C->C, 1x1 conv + bias + ReLU) + max over S + query mask.

    gx_ref   (1, 3, S, TM)  relative neighbor coords, channels-first, M on lanes
    mask_ref (1, 1, TM)     1.0 where the query has >= 1 real in-radius neighbor
    w1_ref   (C, 3)         conv1 weight (C_out, C_in)
    w2_ref   (C, C)         conv2 weight (C_out, C_in)
    b1_ref   (C, 1)         conv1 bias
    b2_ref   (C, 1)         conv2 bias
    out_ref  (1, C, TM)     channels-first output tile, M on the lane axis
    """
    C = out_ref.shape[1]
    TM = out_ref.shape[2]
    S = gx_ref.shape[2]

    w1 = w1_ref[...]            # (C, 3)
    w2 = w2_ref[...]            # (C, C)
    b1 = b1_ref[...]            # (C, 1) -> lane broadcast
    b2 = b2_ref[...]            # (C, 1)

    # ReLU outputs are >= 0, so a zero init is equivalent to the max over S.
    acc = jnp.zeros((C, TM), jnp.float32)
    for s in range(S):                                  # static unroll, S = nsample (small)
        gx_s = gx_ref[0, :, s, :]                       # (3, TM) one neighbor slot
        h1 = jnp.dot(w1, gx_s, preferred_element_type=jnp.float32) + b1
        h1 = jnp.maximum(h1, 0.0)                       # (C, TM)
        h2 = jnp.dot(w2, h1, preferred_element_type=jnp.float32) + b2
        h2 = jnp.maximum(h2, 0.0)                       # (C, TM)
        acc = jnp.maximum(acc, h2)                      # fused max-pool over S

    out_ref[0] = acc * mask_ref[0]                      # (C, TM) * (1, TM), lane-dense store


# ------------------------ grouping (plain-JAX glue) ------------------------- #

def grid_query_and_group(xyz, new_xyz, radius, nsample):
    """Ball query + gather of relative neighbor coordinates.

    xyz (B,N,3), new_xyz (B,M,3) ->
      grouped_xyz (B,M,S,3) relative coords,
      idn (B,M,S) with 1.0 where the slot is a genuine in-radius pick.
    """
    B, N, _ = xyz.shape
    d2 = jnp.sum(jnp.square(new_xyz[:, :, None, :] - xyz[:, None, :, :]), axis=-1)
    in_radius = d2 < radius * radius                            # (B, M, N)
    key = jnp.where(in_radius, jnp.arange(N, dtype=jnp.int32), jnp.int32(N))
    neg_smallest, _ = jax.lax.top_k(-key, nsample)              # single pass
    order = -neg_smallest                                       # (B, M, S) ascending keys
    valid = order < N
    first_hit = jnp.where(valid[..., :1], order[..., :1], 0)    # pad index (0 if no hits)
    idx = jnp.where(valid, order, first_hit)                    # pad slots with first hit
    idn = valid.astype(jnp.float32)

    grouped = jax.vmap(lambda pts, ii: pts[ii])(xyz, idx)       # (B, M, S, 3)
    grouped_xyz = grouped - new_xyz[:, :, None, :]
    return grouped_xyz, idn


# ------------------------------- wrapper ------------------------------------ #

def make_params(key, mlp_spec=(3, 32, 32), scale=0.1):
    """SharedMLP([3, 32, 32], bn=False, instance_norm=False): 2x conv1x1+bias."""
    c0, c1, c2 = mlp_spec
    k1, k2, k3, k4 = jax.random.split(key, 4)
    f32 = jnp.float32
    return {
        "w1": scale * jax.random.normal(k1, (c1, c0), f32),   # (C_out, C_in) = (32, 3)
        "b1": scale * jax.random.normal(k2, (c1, 1), f32),
        "w2": scale * jax.random.normal(k3, (c2, c1), f32),   # (32, 32)
        "b2": scale * jax.random.normal(k4, (c2, 1), f32),
    }


def _choose_tm(m_pad, batch):
    """M-tile: multiple of 128 dividing the padded M, up to 2048; keep >= 2
    grid work units when possible (megacore / v7x dual TensorCore)."""
    tm = 128
    while tm * 2 <= 2048 and m_pad % (tm * 2) == 0:
        tm *= 2
    while batch * (m_pad // tm) < 2 and tm > 128:
        tm //= 2
    return tm


@functools.partial(jax.jit, static_argnames=("radius", "nsample"))
def grouperxyz_forward(xyz, new_xyz, params, features=None, radius=0.5, nsample=8):
    """Matches GrouperxyzForGrids.forward: returns (new_xyz, (B, 32, M))."""
    del features  # unused by the torch forward (groupers are called w/o features)
    B, M, _ = new_xyz.shape
    S = nsample

    gx, idn = grid_query_and_group(xyz, new_xyz, radius, nsample)   # (B,M,S,3),(B,M,S)
    # torch: idn_mask = (idn.sum(dim=2) > 0).float() -- only this per-query mask
    # is consumed downstream, so reduce it before the kernel.
    mask = (jnp.sum(idn, axis=-1) > 0).astype(jnp.float32)[:, None, :]   # (B, 1, M)
    gx_cf = jnp.transpose(gx, (0, 3, 2, 1))                             # (B, 3, S, M)

    w1, w2, b1, b2 = params["w1"], params["w2"], params["b1"], params["b2"]
    C = w2.shape[0]

    # Pad M to a multiple of 128: lane-aligned tiles on all generations; padded
    # queries get mask 0 and are sliced off afterwards.
    M_pad = max(128, ((M + 127) // 128) * 128)
    if M_pad != M:
        pad = M_pad - M
        gx_cf = jnp.pad(gx_cf, ((0, 0), (0, 0), (0, 0), (0, pad)))
        mask = jnp.pad(mask, ((0, 0), (0, 0), (0, pad)))

    TM = _choose_tm(M_pad, B)
    grid = (B, M_pad // TM)

    out = pl.pallas_call(
        grouperxyz_kernel,
        out_shape=jax.ShapeDtypeStruct((B, C, M_pad), jnp.float32),
        grid=grid,
        in_specs=[
            pl.BlockSpec((1, 3, S, TM), lambda b, m: (b, 0, 0, m)),
            pl.BlockSpec((1, 1, TM), lambda b, m: (b, 0, m)),
            pl.BlockSpec((C, 3), lambda b, m: (0, 0)),
            pl.BlockSpec((C, C), lambda b, m: (0, 0)),
            pl.BlockSpec((C, 1), lambda b, m: (0, 0)),
            pl.BlockSpec((C, 1), lambda b, m: (0, 0)),
        ],
        out_specs=pl.BlockSpec((1, C, TM), lambda b, m: (b, 0, m)),
        compiler_params=pltpu.CompilerParams(
            dimension_semantics=("parallel", "parallel"),
            vmem_limit_bytes=32 * 1024 * 1024),
    )(gx_cf, mask, w1, w2, b1, b2)

    if M_pad != M:
        out = out[:, :, :M]
    return new_xyz, out                                           # (B, M, 3), (B, 32, M)


# -------------------------- plain-JAX reference ------------------------------ #

def reference_forward(xyz, new_xyz, params, radius, nsample):
    gx, idn = grid_query_and_group(xyz, new_xyz, radius, nsample)        # (B,M,S,3)
    mask = (jnp.sum(idn, axis=-1) > 0).astype(jnp.float32)               # (B,M)
    h = jnp.einsum("bmsk,ck->bmsc", gx, params["w1"]) + params["b1"][:, 0]
    h = jnp.maximum(h, 0.0)
    h = jnp.einsum("bmsc,dc->bmsd", h, params["w2"]) + params["b2"][:, 0]
    h = jnp.maximum(h, 0.0)
    pooled = jnp.max(h, axis=2)                                          # (B, M, C)
    return jnp.transpose(pooled, (0, 2, 1)) * mask[:, None, :]           # (B, C, M)


# --------------------------------- main -------------------------------------- #

if __name__ == "__main__":
    B, N, M = 2, 32, 16
    radius, nsample = 0.5, 8

    key = jax.random.PRNGKey(0)
    k_xyz, k_param = jax.random.split(key, 2)

    xyz = jax.random.uniform(k_xyz, (B, N, 3), jnp.float32)       # B, N, 3
    new_xyz = xyz[:, :M, :]                                        # B, M, 3 (query points)
    params = make_params(k_param)

    out_xyz, out_features = grouperxyz_forward(
        xyz, new_xyz, params, radius=radius, nsample=nsample)
    jax.block_until_ready(out_features)

    assert out_xyz.shape == (B, M, 3)
    assert out_features.shape == (B, 32, M)
    assert bool(jnp.all(jnp.isfinite(out_features)))

    ref = reference_forward(xyz, new_xyz, params, radius, nsample)
    assert bool(jnp.allclose(out_features, ref, rtol=1e-4, atol=1e-5))

    print("KERNEL_OK")
</pallas_src>

<mosaic_0001>
module attributes {stable_mosaic.version = 11 : i64} {
  func.func @grouperxyz_kernel(%arg0: i32, %arg1: i32, %arg2: memref<1x3x8x128xf32, #tpu.memory_space<vmem>>, %arg3: memref<1x1x128xf32, #tpu.memory_space<vmem>>, %arg4: memref<32x3xf32, #tpu.memory_space<vmem>>, %arg5: memref<32x32xf32, #tpu.memory_space<vmem>>, %arg6: memref<32x1xf32, #tpu.memory_space<vmem>>, %arg7: memref<32x1xf32, #tpu.memory_space<vmem>>, %arg8: memref<1x32x128xf32, #tpu.memory_space<vmem>>) attributes {dimension_semantics = [#tpu.dimension_semantics<parallel>, #tpu.dimension_semantics<parallel>], iteration_bounds = array<i64: 2, 1>, scalar_prefetch = 0 : i64, scratch_operands = 0 : i64, tpu.core_type = #tpu.core_type<tc>, window_params = [{transform_indices = @transform_0, window_bounds = array<i64: 1, 3, 8, 128>}, {transform_indices = @transform_1, window_bounds = array<i64: 1, 1, 128>}, {pipeline_mode = #tpu.pipeline_mode<synchronous>, transform_indices = @transform_2, window_bounds = array<i64: 32, 3>}, {pipeline_mode = #tpu.pipeline_mode<synchronous>, transform_indices = @transform_3, window_bounds = array<i64: 32, 32>}, {pipeline_mode = #tpu.pipeline_mode<synchronous>, transform_indices = @transform_4, window_bounds = array<i64: 32, 1>}, {pipeline_mode = #tpu.pipeline_mode<synchronous>, transform_indices = @transform_5, window_bounds = array<i64: 32, 1>}, {transform_indices = @transform_6, window_bounds = array<i64: 1, 32, 128>}]} {
    %c0 = arith.constant 0 : index
    %c0_0 = arith.constant 0 : index
    %0 = vector.load %arg4[%c0, %c0_0] : memref<32x3xf32, #tpu.memory_space<vmem>>, vector<32x3xf32>
    %c0_1 = arith.constant 0 : index
    %c0_2 = arith.constant 0 : index
    %1 = vector.load %arg5[%c0_1, %c0_2] : memref<32x32xf32, #tpu.memory_space<vmem>>, vector<32x32xf32>
    %c0_3 = arith.constant 0 : index
    %c0_4 = arith.constant 0 : index
    %2 = vector.load %arg6[%c0_3, %c0_4] : memref<32x1xf32, #tpu.memory_space<vmem>>, vector<32x1xf32>
    %c0_5 = arith.constant 0 : index
    %c0_6 = arith.constant 0 : index
    %3 = vector.load %arg7[%c0_5, %c0_6] : memref<32x1xf32, #tpu.memory_space<vmem>>, vector<32x1xf32>
    %cst = arith.constant 0.000000e+00 : f32
    %4 = vector.broadcast %cst : f32 to vector<32x128xf32>
    %c0_7 = arith.constant 0 : index
    %c0_8 = arith.constant 0 : index
    %c0_9 = arith.constant 0 : index
    %c0_10 = arith.constant 0 : index
    %5 = vector.load %arg2[%c0_7, %c0_8, %c0_9, %c0_10] : memref<1x3x8x128xf32, #tpu.memory_space<vmem>>, vector<1x3x1x128xf32>
    %6 = vector.shape_cast %5 : vector<1x3x1x128xf32> to vector<3x128xf32>
    %cst_11 = arith.constant dense<0.000000e+00> : vector<32x128xf32>
    %7 = tpu.matmul %0, %6, %cst_11 {dimension_numbers = #tpu.dot_dimension_numbers<[1], [0], [0], [1], [0, 0, 1, 1], [], []>} : vector<32x3xf32>, vector<3x128xf32>, vector<32x128xf32> -> vector<32x128xf32>
    %8 = vector.broadcast %2 : vector<32x1xf32> to vector<32x128xf32>
    %9 = arith.addf %7, %8 : vector<32x128xf32>
    %cst_12 = arith.constant 0.000000e+00 : f32
    %10 = vector.broadcast %cst_12 : f32 to vector<32x128xf32>
    %11 = arith.maximumf %9, %10 : vector<32x128xf32>
    %cst_13 = arith.constant dense<0.000000e+00> : vector<32x128xf32>
    %12 = tpu.matmul %1, %11, %cst_13 {dimension_numbers = #tpu.dot_dimension_numbers<[1], [0], [0], [1], [0, 0, 1, 1], [], []>} : vector<32x32xf32>, vector<32x128xf32>, vector<32x128xf32> -> vector<32x128xf32>
    %13 = vector.broadcast %3 : vector<32x1xf32> to vector<32x128xf32>
    %14 = arith.addf %12, %13 : vector<32x128xf32>
    %cst_14 = arith.constant 0.000000e+00 : f32
    %15 = vector.broadcast %cst_14 : f32 to vector<32x128xf32>
    %16 = arith.maximumf %14, %15 : vector<32x128xf32>
    %17 = arith.maximumf %4, %16 : vector<32x128xf32>
    %c0_15 = arith.constant 0 : index
    %c0_16 = arith.constant 0 : index
    %c1 = arith.constant 1 : index
    %c0_17 = arith.constant 0 : index
    %18 = vector.load %arg2[%c0_15, %c0_16, %c1, %c0_17] : memref<1x3x8x128xf32, #tpu.memory_space<vmem>>, vector<1x3x1x128xf32>
    %19 = vector.shape_cast %18 : vector<1x3x1x128xf32> to vector<3x128xf32>
    %cst_18 = arith.constant dense<0.000000e+00> : vector<32x128xf32>
    %20 = tpu.matmul %0, %19, %cst_18 {dimension_numbers = #tpu.dot_dimension_numbers<[1], [0], [0], [1], [0, 0, 1, 1], [], []>} : vector<32x3xf32>, vector<3x128xf32>, vector<32x128xf32> -> vector<32x128xf32>
    %21 = vector.broadcast %2 : vector<32x1xf32> to vector<32x128xf32>
    %22 = arith.addf %20, %21 : vector<32x128xf32>
    %cst_19 = arith.constant 0.000000e+00 : f32
    %23 = vector.broadcast %cst_19 : f32 to vector<32x128xf32>
    %24 = arith.maximumf %22, %23 : vector<32x128xf32>
    %cst_20 = arith.constant dense<0.000000e+00> : vector<32x128xf32>
    %25 = tpu.matmul %1, %24, %cst_20 {dimension_numbers = #tpu.dot_dimension_numbers<[1], [0], [0], [1], [0, 0, 1, 1], [], []>} : vector<32x32xf32>, vector<32x128xf32>, vector<32x128xf32> -> vector<32x128xf32>
    %26 = vector.broadcast %3 : vector<32x1xf32> to vector<32x128xf32>
    %27 = arith.addf %25, %26 : vector<32x128xf32>
    %cst_21 = arith.constant 0.000000e+00 : f32
    %28 = vector.broadcast %cst_21 : f32 to vector<32x128xf32>
    %29 = arith.maximumf %27, %28 : vector<32x128xf32>
    %30 = arith.maximumf %17, %29 : vector<32x128xf32>
    %c0_22 = arith.constant 0 : index
    %c0_23 = arith.constant 0 : index
    %c2 = arith.constant 2 : index
    %c0_24 = arith.constant 0 : index
    %31 = vector.load %arg2[%c0_22, %c0_23, %c2, %c0_24] : memref<1x3x8x128xf32, #tpu.memory_space<vmem>>, vector<1x3x1x128xf32>
    %32 = vector.shape_cast %31 : vector<1x3x1x128xf32> to vector<3x128xf32>
    %cst_25 = arith.constant dense<0.000000e+00> : vector<32x128xf32>
    %33 = tpu.matmul %0, %32, %cst_25 {dimension_numbers = #tpu.dot_dimension_numbers<[1], [0], [0], [1], [0, 0, 1, 1], [], []>} : vector<32x3xf32>, vector<3x128xf32>, vector<32x128xf32> -> vector<32x128xf32>
    %34 = vector.broadcast %2 : vector<32x1xf32> to vector<32x128xf32>
    %35 = arith.addf %33, %34 : vector<32x128xf32>
    %cst_26 = arith.constant 0.000000e+00 : f32
    %36 = vector.broadcast %cst_26 : f32 to vector<32x128xf32>
    %37 = arith.maximumf %35, %36 : vector<32x128xf32>
    %cst_27 = arith.constant dense<0.000000e+00> : vector<32x128xf32>
    %38 = tpu.matmul %1, %37, %cst_27 {dimension_numbers = #tpu.dot_dimension_numbers<[1], [0], [0], [1], [0, 0, 1, 1], [], []>} : vector<32x32xf32>, vector<32x128xf32>, vector<32x128xf32> -> vector<32x128xf32>
    %39 = vector.broadcast %3 : vector<32x1xf32> to vector<32x128xf32>
    %40 = arith.addf %38, %39 : vector<32x128xf32>
    %cst_28 = arith.constant 0.000000e+00 : f32
    %41 = vector.broadcast %cst_28 : f32 to vector<32x128xf32>
    %42 = arith.maximumf %40, %41 : vector<32x128xf32>
    %43 = arith.maximumf %30, %42 : vector<32x128xf32>
    %c0_29 = arith.constant 0 : index
    %c0_30 = arith.constant 0 : index
    %c3 = arith.constant 3 : index
    %c0_31 = arith.constant 0 : index
    %44 = vector.load %arg2[%c0_29, %c0_30, %c3, %c0_31] : memref<1x3x8x128xf32, #tpu.memory_space<vmem>>, vector<1x3x1x128xf32>
    %45 = vector.shape_cast %44 : vector<1x3x1x128xf32> to vector<3x128xf32>
    %cst_32 = arith.constant dense<0.000000e+00> : vector<32x128xf32>
    %46 = tpu.matmul %0, %45, %cst_32 {dimension_numbers = #tpu.dot_dimension_numbers<[1], [0], [0], [1], [0, 0, 1, 1], [], []>} : vector<32x3xf32>, vector<3x128xf32>, vector<32x128xf32> -> vector<32x128xf32>
    %47 = vector.broadcast %2 : vector<32x1xf32> to vector<32x128xf32>
    %48 = arith.addf %46, %47 : vector<32x128xf32>
    %cst_33 = arith.constant 0.000000e+00 : f32
    %49 = vector.broadcast %cst_33 : f32 to vector<32x128xf32>
    %50 = arith.maximumf %48, %49 : vector<32x128xf32>
    %cst_34 = arith.constant dense<0.000000e+00> : vector<32x128xf32>
    %51 = tpu.matmul %1, %50, %cst_34 {dimension_numbers = #tpu.dot_dimension_numbers<[1], [0], [0], [1], [0, 0, 1, 1], [], []>} : vector<32x32xf32>, vector<32x128xf32>, vector<32x128xf32> -> vector<32x128xf32>
    %52 = vector.broadcast %3 : vector<32x1xf32> to vector<32x128xf32>
    %53 = arith.addf %51, %52 : vector<32x128xf32>
    %cst_35 = arith.constant 0.000000e+00 : f32
    %54 = vector.broadcast %cst_35 : f32 to vector<32x128xf32>
    %55 = arith.maximumf %53, %54 : vector<32x128xf32>
    %56 = arith.maximumf %43, %55 : vector<32x128xf32>
    %c0_36 = arith.constant 0 : index
    %c0_37 = arith.constant 0 : index
    %c4 = arith.constant 4 : index
    %c0_38 = arith.constant 0 : index
    %57 = vector.load %arg2[%c0_36, %c0_37, %c4, %c0_38] : memref<1x3x8x128xf32, #tpu.memory_space<vmem>>, vector<1x3x1x128xf32>
    %58 = vector.shape_cast %57 : vector<1x3x1x128xf32> to vector<3x128xf32>
    %cst_39 = arith.constant dense<0.000000e+00> : vector<32x128xf32>
    %59 = tpu.matmul %0, %58, %cst_39 {dimension_numbers = #tpu.dot_dimension_numbers<[1], [0], [0], [1], [0, 0, 1, 1], [], []>} : vector<32x3xf32>, vector<3x128xf32>, vector<32x128xf32> -> vector<32x128xf32>
    %60 = vector.broadcast %2 : vector<32x1xf32> to vector<32x128xf32>
    %61 = arith.addf %59, %60 : vector<32x128xf32>
    %cst_40 = arith.constant 0.000000e+00 : f32
    %62 = vector.broadcast %cst_40 : f32 to vector<32x128xf32>
    %63 = arith.maximumf %61, %62 : vector<32x128xf32>
    %cst_41 = arith.constant dense<0.000000e+00> : vector<32x128xf32>
    %64 = tpu.matmul %1, %63, %cst_41 {dimension_numbers = #tpu.dot_dimension_numbers<[1], [0], [0], [1], [0, 0, 1, 1], [], []>} : vector<32x32xf32>, vector<32x128xf32>, vector<32x128xf32> -> vector<32x128xf32>
    %65 = vector.broadcast %3 : vector<32x1xf32> to vector<32x128xf32>
    %66 = arith.addf %64, %65 : vector<32x128xf32>
    %cst_42 = arith.constant 0.000000e+00 : f32
    %67 = vector.broadcast %cst_42 : f32 to vector<32x128xf32>
    %68 = arith.maximumf %66, %67 : vector<32x128xf32>
    %69 = arith.maximumf %56, %68 : vector<32x128xf32>
    %c0_43 = arith.constant 0 : index
    %c0_44 = arith.constant 0 : index
    %c5 = arith.constant 5 : index
    %c0_45 = arith.constant 0 : index
    %70 = vector.load %arg2[%c0_43, %c0_44, %c5, %c0_45] : memref<1x3x8x128xf32, #tpu.memory_space<vmem>>, vector<1x3x1x128xf32>
    %71 = vector.shape_cast %70 : vector<1x3x1x128xf32> to vector<3x128xf32>
    %cst_46 = arith.constant dense<0.000000e+00> : vector<32x128xf32>
    %72 = tpu.matmul %0, %71, %cst_46 {dimension_numbers = #tpu.dot_dimension_numbers<[1], [0], [0], [1], [0, 0, 1, 1], [], []>} : vector<32x3xf32>, vector<3x128xf32>, vector<32x128xf32> -> vector<32x128xf32>
    %73 = vector.broadcast %2 : vector<32x1xf32> to vector<32x128xf32>
    %74 = arith.addf %72, %73 : vector<32x128xf32>
    %cst_47 = arith.constant 0.000000e+00 : f32
    %75 = vector.broadcast %cst_47 : f32 to vector<32x128xf32>
    %76 = arith.maximumf %74, %75 : vector<32x128xf32>
    %cst_48 = arith.constant dense<0.000000e+00> : vector<32x128xf32>
    %77 = tpu.matmul %1, %76, %cst_48 {dimension_numbers = #tpu.dot_dimension_numbers<[1], [0], [0], [1], [0, 0, 1, 1], [], []>} : vector<32x32xf32>, vector<32x128xf32>, vector<32x128xf32> -> vector<32x128xf32>
    %78 = vector.broadcast %3 : vector<32x1xf32> to vector<32x128xf32>
    %79 = arith.addf %77, %78 : vector<32x128xf32>
    %cst_49 = arith.constant 0.000000e+00 : f32
    %80 = vector.broadcast %cst_49 : f32 to vector<32x128xf32>
    %81 = arith.maximumf %79, %80 : vector<32x128xf32>
    %82 = arith.maximumf %69, %81 : vector<32x128xf32>
    %c0_50 = arith.constant 0 : index
    %c0_51 = arith.constant 0 : index
    %c6 = arith.constant 6 : index
    %c0_52 = arith.constant 0 : index
    %83 = vector.load %arg2[%c0_50, %c0_51, %c6, %c0_52] : memref<1x3x8x128xf32, #tpu.memory_space<vmem>>, vector<1x3x1x128xf32>
    %84 = vector.shape_cast %83 : vector<1x3x1x128xf32> to vector<3x128xf32>
    %cst_53 = arith.constant dense<0.000000e+00> : vector<32x128xf32>
    %85 = tpu.matmul %0, %84, %cst_53 {dimension_numbers = #tpu.dot_dimension_numbers<[1], [0], [0], [1], [0, 0, 1, 1], [], []>} : vector<32x3xf32>, vector<3x128xf32>, vector<32x128xf32> -> vector<32x128xf32>
    %86 = vector.broadcast %2 : vector<32x1xf32> to vector<32x128xf32>
    %87 = arith.addf %85, %86 : vector<32x128xf32>
    %cst_54 = arith.constant 0.000000e+00 : f32
    %88 = vector.broadcast %cst_54 : f32 to vector<32x128xf32>
    %89 = arith.maximumf %87, %88 : vector<32x128xf32>
    %cst_55 = arith.constant dense<0.000000e+00> : vector<32x128xf32>
    %90 = tpu.matmul %1, %89, %cst_55 {dimension_numbers = #tpu.dot_dimension_numbers<[1], [0], [0], [1], [0, 0, 1, 1], [], []>} : vector<32x32xf32>, vector<32x128xf32>, vector<32x128xf32> -> vector<32x128xf32>
    %91 = vector.broadcast %3 : vector<32x1xf32> to vector<32x128xf32>
    %92 = arith.addf %90, %91 : vector<32x128xf32>
    %cst_56 = arith.constant 0.000000e+00 : f32
    %93 = vector.broadcast %cst_56 : f32 to vector<32x128xf32>
    %94 = arith.maximumf %92, %93 : vector<32x128xf32>
    %95 = arith.maximumf %82, %94 : vector<32x128xf32>
    %c0_57 = arith.constant 0 : index
    %c0_58 = arith.constant 0 : index
    %c7 = arith.constant 7 : index
    %c0_59 = arith.constant 0 : index
    %96 = vector.load %arg2[%c0_57, %c0_58, %c7, %c0_59] : memref<1x3x8x128xf32, #tpu.memory_space<vmem>>, vector<1x3x1x128xf32>
    %97 = vector.shape_cast %96 : vector<1x3x1x128xf32> to vector<3x128xf32>
    %cst_60 = arith.constant dense<0.000000e+00> : vector<32x128xf32>
    %98 = tpu.matmul %0, %97, %cst_60 {dimension_numbers = #tpu.dot_dimension_numbers<[1], [0], [0], [1], [0, 0, 1, 1], [], []>} : vector<32x3xf32>, vector<3x128xf32>, vector<32x128xf32> -> vector<32x128xf32>
    %99 = vector.broadcast %2 : vector<32x1xf32> to vector<32x128xf32>
    %100 = arith.addf %98, %99 : vector<32x128xf32>
    %cst_61 = arith.constant 0.000000e+00 : f32
    %101 = vector.broadcast %cst_61 : f32 to vector<32x128xf32>
    %102 = arith.maximumf %100, %101 : vector<32x128xf32>
    %cst_62 = arith.constant dense<0.000000e+00> : vector<32x128xf32>
    %103 = tpu.matmul %1, %102, %cst_62 {dimension_numbers = #tpu.dot_dimension_numbers<[1], [0], [0], [1], [0, 0, 1, 1], [], []>} : vector<32x32xf32>, vector<32x128xf32>, vector<32x128xf32> -> vector<32x128xf32>
    %104 = vector.broadcast %3 : vector<32x1xf32> to vector<32x128xf32>
    %105 = arith.addf %103, %104 : vector<32x128xf32>
    %cst_63 = arith.constant 0.000000e+00 : f32
    %106 = vector.broadcast %cst_63 : f32 to vector<32x128xf32>
    %107 = arith.maximumf %105, %106 : vector<32x128xf32>
    %108 = arith.maximumf %95, %107 : vector<32x128xf32>
    %c0_64 = arith.constant 0 : index
    %c0_65 = arith.constant 0 : index
    %c0_66 = arith.constant 0 : index
    %109 = vector.load %arg3[%c0_64, %c0_65, %c0_66] : memref<1x1x128xf32, #tpu.memory_space<vmem>>, vector<1x1x128xf32>
    %110 = vector.shape_cast %109 : vector<1x1x128xf32> to vector<1x128xf32>
    %111 = vector.broadcast %110 : vector<1x128xf32> to vector<32x128xf32>
    %112 = arith.mulf %108, %111 : vector<32x128xf32>
    %c0_67 = arith.constant 0 : index
    %c0_68 = arith.constant 0 : index
    %c0_69 = arith.constant 0 : index
    %113 = vector.load %arg8[%c0_67, %c0_68, %c0_69] : memref<1x32x128xf32, #tpu.memory_space<vmem>>, vector<1x32x128xf32>
    %114 = vector.shape_cast %113 : vector<1x32x128xf32> to vector<32x128xf32>
    %115 = vector.shape_cast %112 : vector<32x128xf32> to vector<1x32x128xf32>
    tpu.vector_store %arg8[%c0_67, %c0_68, %c0_69], %115 {strides = array<i32>} : memref<1x32x128xf32, #tpu.memory_space<vmem>>, vector<1x32x128xf32>,
    return
  }
  func.func @transform_0(%arg0: i32, %arg1: i32) -> (i32, i32, i32, i32) {
    %c0_i32 = arith.constant 0 : i32
    %c0_i32_0 = arith.constant 0 : i32
    %c0_i32_1 = arith.constant 0 : i32
    return %arg0, %c0_i32, %c0_i32_0, %arg1 : i32, i32, i32, i32
  }
  func.func @transform_1(%arg0: i32, %arg1: i32) -> (i32, i32, i32) {
    %c0_i32 = arith.constant 0 : i32
    %c0_i32_0 = arith.constant 0 : i32
    return %arg0, %c0_i32, %arg1 : i32, i32, i32
  }
  func.func @transform_2(%arg0: i32, %arg1: i32) -> (i32, i32) {
    %c0_i32 = arith.constant 0 : i32
    %c0_i32_0 = arith.constant 0 : i32
    %c0_i32_1 = arith.constant 0 : i32
    return %c0_i32, %c0_i32_0 : i32, i32
  }
  func.func @transform_3(%arg0: i32, %arg1: i32) -> (i32, i32) {
    %c0_i32 = arith.constant 0 : i32
    %c0_i32_0 = arith.constant 0 : i32
    %c0_i32_1 = arith.constant 0 : i32
    return %c0_i32, %c0_i32_0 : i32, i32
  }
  func.func @transform_4(%arg0: i32, %arg1: i32) -> (i32, i32) {
    %c0_i32 = arith.constant 0 : i32
    %c0_i32_0 = arith.constant 0 : i32
    %c0_i32_1 = arith.constant 0 : i32
    return %c0_i32, %c0_i32_0 : i32, i32
  }
  func.func @transform_5(%arg0: i32, %arg1: i32) -> (i32, i32) {
    %c0_i32 = arith.constant 0 : i32
    %c0_i32_0 = arith.constant 0 : i32
    %c0_i32_1 = arith.constant 0 : i32
    return %c0_i32, %c0_i32_0 : i32, i32
  }
  func.func @transform_6(%arg0: i32, %arg1: i32) -> (i32, i32, i32) {
    %c0_i32 = arith.constant 0 : i32
    %c0_i32_0 = arith.constant 0 : i32
    return %arg0, %c0_i32, %arg1 : i32, i32, i32
  }
}

</mosaic_0001>

<bundles_post_ra>
// kernel: grouperxyz_forward.1
= control target key start
LH: loop header
LB: loop body
LE: loop exit
PB: predicated region body
PF: predicated region fallthrough
CT: control target
= control target key end

     0   :  { %s2575_s21 = smov 0   ;;  %s2577_s22 = smov 0   ;;  %s2946_s0 = inlined_call_operand.vmem [shape: f32[2,3,8,128], index: 0, kind: input, shape index: {}]   ;;  %s2947_s1 = inlined_call_operand.vmem [shape: f32[2,1,128], index: 1, kind: input, shape index: {}]   ;;  %s2948_s2 = inlined_call_operand.vmem [shape: f32[32,3], index: 2, kind: input, shape index: {}]   ;;  %s2949_s3 = inlined_call_operand.vmem [shape: f32[32,32], index: 3, kind: input, shape index: {}]   ;;  %s2950_s4 = inlined_call_operand.vmem [shape: f32[32,1], index: 4, kind: input, shape index: {}]   ;;  %s2951_s5 = inlined_call_operand.vmem [shape: f32[32,1], index: 5, kind: input, shape index: {}]   ;;  %s2952_s6 = inlined_call_operand.vmem [shape: f32[2,32,128], index: 6, kind: output, shape index: {}]  }
   0x1   :  { %s2579_s23 = smov 0  }
   0x2 LB: > { %s28_s24 = sadd.s32 1, %s2533_s22  ;;  %p2059_p0 = scmp.ge.s32.totalorder %s2537_s23, 1  ;;  %s2537_s23 = sphi %s2579_s23, %s16_s23   ;;  %s2533_s22 = sphi %s2577_s22, %s2954_s22   ;;  %s2529_s21 = sphi %s2575_s21, %s2953_s21  }
   0x3   : > { %p30_p1 = scmp.ge.s32.totalorder %s28_s24, 2  ;;  %p244_p2 = scmp.lt.s32.totalorder %s2537_s23, 3 }
   0x5   : > { %s2956_s24 = smov (%p30_p1, %s28_s24), 0  ;;  %p245_p3 = pnand %p2059_p0, %p244_p2 }
   0x6   : > { %p286_p4 = scmp.lt.s32.totalorder (!%p245_p3), %s2529_s21, 1  ;;  %v2596_v0 = vld [vmem:[%s2948_s2] sm:$0xff] (!%p245_p3)  ;;  %vm356_vm0 = vcmask (!%p245_p3), 23552   ;;  %v2539_v1 = vmov (!%p245_p3), 0   ;;  %v318_v3 = vld [vmem:[%s2950_s4 + $0x10] sm:$0xff] (!%p245_p3)  ;;  %v317_v4 = vld [vmem:[%s2950_s4 + $0x8] sm:$0xff] (!%p245_p3) }
   0x7   : > { %248 = sbr.rel (%p245_p3) target bundleno = 531 (0x213), region = 44  ;;  %2245 = vmatprep.mubr.msk.f32.mxu0 (!%p245_p3), %vm356_vm0, %v2596_v0  ;;  %2513 = vset.pattern.permute.xlu0 (!%p245_p3), %v2539_v1  ;;  %v316_v2 = vld [vmem:[%s2950_s4] sm:$0xff] (!%p245_p3)  ;;  %v319_v5 = vld [vmem:[%s2950_s4 + $0x18] sm:$0xff] (!%p245_p3)  ;;  %vm351_vm1 = vcmask (!%p245_p3), 1041409   ;;  %vm354_vm2 = vcmask (!%p245_p3), 1042434   ;;  %v321_v7 = vld [vmem:[%s2951_s5 + $0x8] sm:$0xff] (!%p245_p3) }
   0x8   : > { %2514 = vset.pattern.permute.xlu1 (!%p245_p3), %v2539_v1  ;;  %329 = vperm.xlu0 (!%p245_p3), %2513, %v316_v2   ;;  %v320_v6 = vld [vmem:[%s2951_s5] sm:$0xff] (!%p245_p3)  ;;  %vm369_vm3 = vcmask (!%p245_p3), 1042432   ;;  %v2640_v23 = vld [vmem:[%s2948_s2 + $0x8] sm:$0xff] (!%p245_p3)  ;;  %v2649_v29 = vld [vmem:[%s2948_s2 + $0x10] sm:$0xff] (!%p245_p3)  ;;  %vm481_vm4 = vcmask (!%p245_p3), 261120  }
   0x9   : > { %339 = vperm.xlu1 (!%p245_p3), %2514, %v318_v3   ;;  %v322_v31 = vld [vmem:[%s2951_s5 + $0x10] sm:$0xff] (!%p245_p3)  ;;  %v323_v35 = vld [vmem:[%s2951_s5 + $0x18] sm:$0xff] (!%p245_p3) }
   0xa   : > { %v2670_v36 = vld [vmem:[%s2948_s2 + $0x18] sm:$0xff] (!%p245_p3) }
   0xc   : > { %334 = vperm.xlu0 (!%p245_p3), %2513, %v317_v4  }
   0xd   : > { %344 = vperm.xlu1 (!%p245_p3), %2514, %v319_v5  }
   0xe   : > { %s2958_s21 = smov (!%p286_p4, %s2529_s21), 1 }
   0xf   : > { %s2487_s7 = smul.u32 24, %s2958_s21  ;;  %s299_s19 = scalar_lea.vmem %s2947_s1, %s2958_s21 }
  0x10   : > { %463 = vperm.xlu0 %2513, %v320_v6   ;;  %v2768_v6 = vld [vmem:[%s2949_s3] sm:$0xff]  ;;  %s2138_s20 = sshll.u32 %s2958_s21, 5 }
  0x11   : > { %s2618_s14 = scalar_lea.vmem %s2946_s0, %s2487_s7  ;;  %468 = vperm.xlu1 %2514, %v321_v7   ;;  %2259 = vmatprep.mubr.msk.f32.mxu1 %vm481_vm4, %v2768_v6  ;;  %s307_s27 = scalar_lea.vmem %s2952_s6, %s2138_s20 }
  0x12   : > { %v324_v8 = vld [vmem:[%s2618_s14] sm:$0x1]  ;;  %v325_v9 = vld [vmem:[%s2618_s14 + $0x8] sm:$0x1]  ;;  %v326_v10 = vld [vmem:[%s2618_s14 + $0x10] sm:$0x1] }
  0x13   : > { %v350_v11 = vrot.slane %v325_v9, 7  ;;  %v353_v12 = vrot.slane %v326_v10, 6  ;;  %v587_v13 = vld [vmem:[%s2618_s14 + $0x1] sm:$0x1]  ;;  %v588_v14 = vld [vmem:[%s2618_s14 + $0x9] sm:$0x1] }
  0x14   : > { %v589_v15 = vld [vmem:[%s2618_s14 + $0x11] sm:$0x1]  ;;  %v593_v16 = vrot.slane %v588_v14, 7  ;;  %v781_v17 = vld [vmem:[%s2618_s14 + $0x2] sm:$0x1]  ;;  %473 = vperm.xlu0 %2513, %v322_v31  }
  0x15   : > { %v352_v18 = vsel %vm351_vm1, %v350_v11, %v324_v8  ;;  %v595_v19 = vrot.slane %v589_v15, 6  ;;  %v782_v20 = vld [vmem:[%s2618_s14 + $0xa] sm:$0x1]  ;;  %v783_v21 = vld [vmem:[%s2618_s14 + $0x12] sm:$0x1]  ;;  %478 = vperm.xlu1 %2514, %v323_v35  }
  0x16   : > { %v355_v22 = vsel %vm354_vm2, %v353_v12, %v352_v18  ;;  %v594_v24 = vsel %vm351_vm1, %v593_v16, %v587_v13  ;;  %v787_v25 = vrot.slane %v782_v20, 7  ;;  %v789_v26 = vrot.slane %v783_v21, 6  ;;  %v976_v27 = vld [vmem:[%s2618_s14 + $0xb] sm:$0x1]  ;;  %v977_v33 = vld [vmem:[%s2618_s14 + $0x13] sm:$0x1] }
  0x17   : > { %2243 = vmatprep.subr.msk.mxu0 %vm369_vm3, %v355_v22  ;;  %v596_v28 = vsel %vm354_vm2, %v595_v19, %v594_v24  ;;  %v981_v34 = vrot.slane %v976_v27, 7  ;;  %v975_v37 = vld [vmem:[%s2618_s14 + $0x3] sm:$0x1]  ;;  %v983_v38 = vrot.slane %v977_v33, 6  ;;  %v1170_v40 = vld [vmem:[%s2618_s14 + $0xc] sm:$0x1] }
  0x18   : > { %2244 = vmatpush3.msk.msra.mxu0 %vm369_vm3, %v355_v22  ;;  %v788_v30 = vsel %vm351_vm1, %v787_v25, %v781_v17  ;;  %v1171_v42 = vld [vmem:[%s2618_s14 + $0x14] sm:$0x1]  ;;  %v1175_v43 = vrot.slane %v1170_v40, 7  ;;  %v1169_v44 = vld [vmem:[%s2618_s14 + $0x4] sm:$0x1]  ;;  %v2792_v33 = vld [vmem:[%s2949_s3 + $0x8] sm:$0xff] }
  0x19   : > { %2246 = vmatmul.mubr.msk.f32.vlgmr.msra.gmra.mrb[0].mxu0 %vm356_vm0, %v2640_v23  ;;  %2265 = vmatprep.subr.msk.mxu0 %vm369_vm3, %v596_v28  ;;  %v790_v32 = vsel %vm354_vm2, %v789_v26, %v788_v30  ;;  %v982_v39 = vsel %vm351_vm1, %v981_v34, %v975_v37  ;;  %v1177_v45 = vrot.slane %v1171_v42, 6  ;;  %v1364_v47 = vld [vmem:[%s2618_s14 + $0xd] sm:$0x1]  ;;  %v1365_v49 = vld [vmem:[%s2618_s14 + $0x15] sm:$0x1]  ;;  %v2808_v42 = vld [vmem:[%s2949_s3 + $0x18] sm:$0xff] }
  0x1a   : > { %2266 = vmatpush3.msk.msra.mxu0 %vm369_vm3, %v596_v28  ;;  %2248 = vmatprep.mubr.msk.f32.mxu0 %vm356_vm0, %v2649_v29  ;;  %v984_v41 = vsel %vm354_vm2, %v983_v38, %v982_v39  ;;  %v1176_v46 = vsel %vm351_vm1, %v1175_v43, %v1169_v44  ;;  %v1369_v50 = vrot.slane %v1364_v47, 7  ;;  %v1363_v51 = vld [vmem:[%s2618_s14 + $0x5] sm:$0x1]  ;;  %v1371_v52 = vrot.slane %v1365_v49, 6  ;;  %v1558_v54 = vld [vmem:[%s2618_s14 + $0xe] sm:$0x1] }
  0x1b   : > { %2287 = vmatprep.subr.msk.mxu0 %vm369_vm3, %v790_v32  ;;  %v1178_v48 = vsel %vm354_vm2, %v1177_v45, %v1176_v46  ;;  %v1559_v56 = vld [vmem:[%s2618_s14 + $0x16] sm:$0x1]  ;;  %v1563_v57 = vrot.slane %v1558_v54, 7  ;;  %v1557_v58 = vld [vmem:[%s2618_s14 + $0x6] sm:$0x1] }
  0x1c   : > { %v1370_v53 = vsel %vm351_vm1, %v1369_v50, %v1363_v51  ;;  %v1565_v59 = vrot.slane %v1559_v56, 6  ;;  %v1752_v61 = vld [vmem:[%s2618_s14 + $0xf] sm:$0x1]  ;;  %v1753_v63 = vld [vmem:[%s2618_s14 + $0x17] sm:$0x1] }
  0x1d   : > { %2249 = vmatmul.mubr.msk.f32.gmra.mrb[2].mxu0 %vm356_vm0, %v2670_v36  ;;  %v1372_v55 = vsel %vm354_vm2, %v1371_v52, %v1370_v53  ;;  %v1564_v60 = vsel %vm351_vm1, %v1563_v57, %v1557_v58  ;;  %v1757_v1 = vrot.slane %v1752_v61, 7  ;;  %v1751_v2 = vld [vmem:[%s2618_s14 + $0x7] sm:$0x1]  ;;  %v1759_v3 = vrot.slane %v1753_v63, 6 }
  0x1e   : > { %2267 = vmatprep.mubr.msk.f32.mxu0 %vm356_vm0, %v2596_v0  ;;  %v1566_v62 = vsel %vm354_vm2, %v1565_v59, %v1564_v60 }
  0x1f   : > { %v1758_v4 = vsel %vm351_vm1, %v1757_v1, %v1751_v2 }
  0x20   : > { %v1760_v5 = vsel %vm354_vm2, %v1759_v3, %v1758_v4 }
  0x21   : > { %2268 = vmatmul.mubr.msk.f32.vlgmr.msra.gmra.mrb[4].mxu0 %vm356_vm0, %v2640_v23 }
  0x22   : > { %2288 = vmatpush3.msk.msra.mxu0 %vm369_vm3, %v790_v32  ;;  %2270 = vmatprep.mubr.msk.f32.mxu0 %vm356_vm0, %v2649_v29 }
  0x23   : > { %2309 = vmatprep.subr.msk.mxu0 %vm369_vm3, %v984_v41 }
  0x25   : > { %2271 = vmatmul.mubr.msk.f32.gmra.mrb[6].mxu0 %vm356_vm0, %v2670_v36 }
  0x26   : > { %2289 = vmatprep.mubr.msk.f32.mxu0 %vm356_vm0, %v2596_v0 }
  0x29   : > { %2290 = vmatmul.mubr.msk.f32.vlgmr.msra.gmra.mrb[8].mxu0 %vm356_vm0, %v2640_v23 }
  0x2a   : > { %2310 = vmatpush3.msk.msra.mxu0 %vm369_vm3, %v984_v41  ;;  %2292 = vmatprep.mubr.msk.f32.mxu0 %vm356_vm0, %v2649_v29 }
  0x2b   : > { %2331 = vmatprep.subr.msk.mxu0 %vm369_vm3, %v1178_v48 }
  0x2d   : > { %2293 = vmatmul.mubr.msk.f32.gmra.mrb[10].mxu0 %vm356_vm0, %v2670_v36 }
  0x2e   : > { %2311 = vmatprep.mubr.msk.f32.mxu0 %vm356_vm0, %v2596_v0 }
  0x31   : > { %2312 = vmatmul.mubr.msk.f32.vlgmr.msra.gmra.mrb[12].mxu0 %vm356_vm0, %v2640_v23 }
  0x32   : > { %2332 = vmatpush3.msk.msra.mxu0 %vm369_vm3, %v1178_v48  ;;  %2314 = vmatprep.mubr.msk.f32.mxu0 %vm356_vm0, %v2649_v29 }
  0x33   : > { %2353 = vmatprep.subr.msk.mxu0 %vm369_vm3, %v1372_v55 }
  0x35   : > { %2315 = vmatmul.mubr.msk.f32.gmra.mrb[14].mxu0 %vm356_vm0, %v2670_v36 }
  0x36   : > { %2333 = vmatprep.mubr.msk.f32.mxu0 %vm356_vm0, %v2596_v0 }
  0x39   : > { %2334 = vmatmul.mubr.msk.f32.vlgmr.msra.gmra.mrb[16].mxu0 %vm356_vm0, %v2640_v23 }
  0x3a   : > { %2354 = vmatpush3.msk.msra.mxu0 %vm369_vm3, %v1372_v55  ;;  %2336 = vmatprep.mubr.msk.f32.mxu0 %vm356_vm0, %v2649_v29 }
  0x3b   : > { %2375 = vmatprep.subr.msk.mxu0 %vm369_vm3, %v1566_v62 }
  0x3d   : > { %2337 = vmatmul.mubr.msk.f32.gmra.mrb[18].mxu0 %vm356_vm0, %v2670_v36 }
  0x3e   : > { %2355 = vmatprep.mubr.msk.f32.mxu0 %vm356_vm0, %v2596_v0 }
  0x41   : > { %2356 = vmatmul.mubr.msk.f32.vlgmr.msra.gmra.mrb[20].mxu0 %vm356_vm0, %v2640_v23 }
  0x42   : > { %2376 = vmatpush3.msk.msra.mxu0 %vm369_vm3, %v1566_v62  ;;  %2358 = vmatprep.mubr.msk.f32.mxu0 %vm356_vm0, %v2649_v29 }
  0x43   : > { %2397 = vmatprep.subr.msk.mxu0 %vm369_vm3, %v1760_v5 }
  0x45   : > { %2359 = vmatmul.mubr.msk.f32.gmra.mrb[22].mxu0 %vm356_vm0, %v2670_v36 }
  0x46   : > { %2377 = vmatprep.mubr.msk.f32.mxu0 %vm356_vm0, %v2596_v0 }
  0x49   : > { %2378 = vmatmul.mubr.msk.f32.vlgmr.msra.gmra.mrb[24].mxu0 %vm356_vm0, %v2640_v23 }
  0x4a   : > { %2398 = vmatpush3.msk.msra.mxu0 %vm369_vm3, %v1760_v5  ;;  %2380 = vmatprep.mubr.msk.f32.mxu0 %vm356_vm0, %v2649_v29 }
  0x4d   : > { %2381 = vmatmul.mubr.msk.f32.gmra.mrb[26].mxu0 %vm356_vm0, %v2670_v36 }
  0x4e   : > { %2399 = vmatprep.mubr.msk.f32.mxu0 %vm356_vm0, %v2596_v0 }
  0x51   : > { %2400 = vmatmul.mubr.msk.f32.vlgmr.msra.gmra.mrb[28].mxu0 %vm356_vm0, %v2640_v23 }
  0x52   : > { %2402 = vmatprep.mubr.msk.f32.mxu0 %vm356_vm0, %v2649_v29 }
  0x55   : > { %2403 = vmatmul.mubr.msk.f32.gmra.mrb[30].mxu0 %vm356_vm0, %v2670_v36  ;;  %v2798_v36 = vld [vmem:[%s2949_s3 + $0x10] sm:$0xff] }
  0x56   : > { %2413 = vmatprep.mubr.msk.f32.mxu0 %vm481_vm4, %v2768_v6 }
  0x87   : > { %v2774_v0 = vpop.permute.xlu0 %329 }
  0x88   : > { %v2776_v7 = vpop.permute.xlu1 %339 }
  0x8b   : > { %v2778_v8 = vpop.permute.xlu0 %334 }
  0x8c   : > { %v2782_v14 = vpop.permute.xlu1 %344 }
  0xec   : > { %v2247_v9 = vpop.f32.mrb[0].mxu0 }
  0xed   : > { %v444_v10 = vadd.f32 %v2247_v9, %v2778_v8  ;;  %v438_v11 = vpop.f32.mrb[1].mxu0 }
  0xee   : > { %v439_v12 = vadd.f32 %v438_v11, %v2774_v0 }
  0xef   : > { %v458_v13 = vmax.f32 %v444_v10, 0.0 }
  0xf0   : > { %v457_v15 = vmax.f32 %v439_v12, 0.0  ;;  %v2250_v16 = vpop.f32.mrb[2].mxu0 }
  0xf1   : > { %v454_v17 = vadd.f32 %v2250_v16, %v2782_v14  ;;  %v448_v18 = vpop.f32.mrb[3].mxu0 }
  0xf2   : > { %v449_v19 = vadd.f32 %v448_v18, %v2776_v7  ;;  %v2419_v20 = vpack.c.bf16 %v458_v13, %v457_v15 }
  0xf3   : > { %v460_v21 = vmax.f32 %v454_v17, 0.0 }
  0xf4   : > { %v459_v22 = vmax.f32 %v449_v19, 0.0  ;;  %2420 = vmatprep.subr.bf16.mxu1 %v2419_v20  ;;  %v2269_v23 = vpop.f32.mrb[4].mxu0 }
  0xf5   : > { %v671_v24 = vadd.f32 %v2269_v23, %v2778_v8  ;;  %2422 = vmatpush3.bf16.msra.mxu1 %v2419_v20  ;;  %v665_v25 = vpop.f32.mrb[5].mxu0 }
  0xf6   : > { %v2423_v26 = vpack.c.bf16 %v460_v21, %v459_v22  ;;  %v666_v27 = vadd.f32 %v665_v25, %v2774_v0 }
  0xf7   : > { %v685_v28 = vmax.f32 %v671_v24, 0.0 }
  0xf8   : > { %v684_v29 = vmax.f32 %v666_v27, 0.0  ;;  %2424 = vmatprep.subr.bf16.mxu1 %v2423_v26  ;;  %v2272_v30 = vpop.f32.mrb[6].mxu0 }
  0xf9   : > { %v681_v31 = vadd.f32 %v2272_v30, %v2782_v14  ;;  %2426 = vmatpush3.bf16.msra.mxu1 %v2423_v26  ;;  %v675_v32 = vpop.f32.mrb[7].mxu0 }
  0xfa   : > { %v2427_v34 = vpack.c.bf16 %v685_v28, %v684_v29  ;;  %v676_v35 = vadd.f32 %v675_v32, %v2776_v7 }
  0xfb   : > { %v687_v37 = vmax.f32 %v681_v31, 0.0 }
  0xfc   : > { %v686_v38 = vmax.f32 %v676_v35, 0.0  ;;  %2260 = vmatmul.mubr.msk.f32.vlgmr.msra.gmra.mrb[0].mxu1 %vm481_vm4, %v2792_v33  ;;  %2428 = vmatprep.subr.bf16.mxu1 %v2427_v34  ;;  %v2291_v39 = vpop.f32.mrb[8].mxu0 }
  0xfd   : > { %v865_v40 = vadd.f32 %v2291_v39, %v2778_v8  ;;  %2430 = vmatpush3.bf16.msra.mxu1 %v2427_v34  ;;  %v859_v41 = vpop.f32.mrb[9].mxu0  ;;  %2262 = vmatprep.mubr.msk.f32.mxu1 %vm481_vm4, %v2798_v36 }
  0xfe   : > { %v2431_v43 = vpack.c.bf16 %v687_v37, %v686_v38  ;;  %v860_v44 = vadd.f32 %v859_v41, %v2774_v0 }
  0xff   : > { %v879_v45 = vmax.f32 %v865_v40, 0.0 }
 0x100   : > { %v878_v46 = vmax.f32 %v860_v44, 0.0  ;;  %2263 = vmatmul.mubr.msk.f32.gmra.mrb[2].mxu1 %vm481_vm4, %v2808_v42  ;;  %2432 = vmatprep.subr.bf16.mxu1 %v2431_v43  ;;  %v2294_v47 = vpop.f32.mrb[10].mxu0 }
 0x101   : > { %v875_v48 = vadd.f32 %v2294_v47, %v2782_v14  ;;  %2434 = vmatpush3.bf16.msra.mxu1 %v2431_v43  ;;  %v869_v49 = vpop.f32.mrb[11].mxu0  ;;  %2281 = vmatprep.mubr.msk.f32.mxu1 %vm481_vm4, %v2768_v6 }
 0x102   : > { %v2435_v50 = vpack.c.bf16 %v879_v45, %v878_v46  ;;  %v870_v51 = vadd.f32 %v869_v49, %v2776_v7 }
 0x103   : > { %v881_v52 = vmax.f32 %v875_v48, 0.0 }
 0x104   : > { %v880_v53 = vmax.f32 %v870_v51, 0.0  ;;  %2282 = vmatmul.mubr.msk.f32.vlgmr.msra.gmra.mrb[4].mxu1 %vm481_vm4, %v2792_v33  ;;  %2436 = vmatprep.subr.bf16.mxu1 %v2435_v50  ;;  %v2313_v54 = vpop.f32.mrb[12].mxu0 }
 0x105   : > { %v1059_v55 = vadd.f32 %v2313_v54, %v2778_v8  ;;  %2438 = vmatpush3.bf16.msra.mxu1 %v2435_v50  ;;  %v1053_v56 = vpop.f32.mrb[13].mxu0  ;;  %2284 = vmatprep.mubr.msk.f32.mxu1 %vm481_vm4, %v2798_v36 }
 0x106   : > { %v2439_v57 = vpack.c.bf16 %v881_v52, %v880_v53  ;;  %v1054_v58 = vadd.f32 %v1053_v56, %v2774_v0 }
 0x107   : > { %v1073_v59 = vmax.f32 %v1059_v55, 0.0 }
 0x108   : > { %v1072_v60 = vmax.f32 %v1054_v58, 0.0  ;;  %2285 = vmatmul.mubr.msk.f32.gmra.mrb[6].mxu1 %vm481_vm4, %v2808_v42  ;;  %2440 = vmatprep.subr.bf16.mxu1 %v2439_v57  ;;  %v2316_v61 = vpop.f32.mrb[14].mxu0 }
 0x109   : > { %v1069_v62 = vadd.f32 %v2316_v61, %v2782_v14  ;;  %2442 = vmatpush3.bf16.msra.mxu1 %v2439_v57  ;;  %v1063_v63 = vpop.f32.mrb[15].mxu0  ;;  %2303 = vmatprep.mubr.msk.f32.mxu1 %vm481_vm4, %v2768_v6 }
 0x10a   : > { %v2443_v1 = vpack.c.bf16 %v1073_v59, %v1072_v60  ;;  %v1064_v2 = vadd.f32 %v1063_v63, %v2776_v7 }
 0x10b   : > { %v1075_v3 = vmax.f32 %v1069_v62, 0.0 }
 0x10c   : > { %v1074_v4 = vmax.f32 %v1064_v2, 0.0  ;;  %2304 = vmatmul.mubr.msk.f32.vlgmr.msra.gmra.mrb[8].mxu1 %vm481_vm4, %v2792_v33  ;;  %2444 = vmatprep.subr.bf16.mxu1 %v2443_v1  ;;  %v2335_v5 = vpop.f32.mrb[16].mxu0 }
 0x10d   : > { %v1253_v9 = vadd.f32 %v2335_v5, %v2778_v8  ;;  %2446 = vmatpush3.bf16.msra.mxu1 %v2443_v1  ;;  %v1247_v10 = vpop.f32.mrb[17].mxu0  ;;  %2306 = vmatprep.mubr.msk.f32.mxu1 %vm481_vm4, %v2798_v36 }
 0x10e   : > { %v2447_v11 = vpack.c.bf16 %v1075_v3, %v1074_v4  ;;  %v1248_v12 = vadd.f32 %v1247_v10, %v2774_v0 }
 0x10f   : > { %v1267_v13 = vmax.f32 %v1253_v9, 0.0 }
 0x110   : > { %v1266_v15 = vmax.f32 %v1248_v12, 0.0  ;;  %2307 = vmatmul.mubr.msk.f32.gmra.mrb[10].mxu1 %vm481_vm4, %v2808_v42  ;;  %2448 = vmatprep.subr.bf16.mxu1 %v2447_v11  ;;  %v2338_v16 = vpop.f32.mrb[18].mxu0 }
 0x111   : > { %v1263_v17 = vadd.f32 %v2338_v16, %v2782_v14  ;;  %2450 = vmatpush3.bf16.msra.mxu1 %v2447_v11  ;;  %v1257_v18 = vpop.f32.mrb[19].mxu0  ;;  %2325 = vmatprep.mubr.msk.f32.mxu1 %vm481_vm4, %v2768_v6 }
 0x112   : > { %v2451_v19 = vpack.c.bf16 %v1267_v13, %v1266_v15  ;;  %v1258_v20 = vadd.f32 %v1257_v18, %v2776_v7 }
 0x113   : > { %v1269_v21 = vmax.f32 %v1263_v17, 0.0 }
 0x114   : > { %v1268_v22 = vmax.f32 %v1258_v20, 0.0  ;;  %2326 = vmatmul.mubr.msk.f32.vlgmr.msra.gmra.mrb[12].mxu1 %vm481_vm4, %v2792_v33  ;;  %2452 = vmatprep.subr.bf16.mxu1 %v2451_v19  ;;  %v2357_v23 = vpop.f32.mrb[20].mxu0 }
 0x115   : > { %v1447_v24 = vadd.f32 %v2357_v23, %v2778_v8  ;;  %2454 = vmatpush3.bf16.msra.mxu1 %v2451_v19  ;;  %v1441_v25 = vpop.f32.mrb[21].mxu0  ;;  %2328 = vmatprep.mubr.msk.f32.mxu1 %vm481_vm4, %v2798_v36 }
 0x116   : > { %v2455_v26 = vpack.c.bf16 %v1269_v21, %v1268_v22  ;;  %v1442_v27 = vadd.f32 %v1441_v25, %v2774_v0 }
 0x117   : > { %v1461_v28 = vmax.f32 %v1447_v24, 0.0 }
 0x118   : > { %v1460_v29 = vmax.f32 %v1442_v27, 0.0  ;;  %2329 = vmatmul.mubr.msk.f32.gmra.mrb[14].mxu1 %vm481_vm4, %v2808_v42  ;;  %2456 = vmatprep.subr.bf16.mxu1 %v2455_v26  ;;  %v2360_v30 = vpop.f32.mrb[22].mxu0 }
 0x119   : > { %v1457_v31 = vadd.f32 %v2360_v30, %v2782_v14  ;;  %2458 = vmatpush3.bf16.msra.mxu1 %v2455_v26  ;;  %v1451_v32 = vpop.f32.mrb[23].mxu0  ;;  %2347 = vmatprep.mubr.msk.f32.mxu1 %vm481_vm4, %v2768_v6 }
 0x11a   : > { %v2459_v34 = vpack.c.bf16 %v1461_v28, %v1460_v29  ;;  %v1452_v35 = vadd.f32 %v1451_v32, %v2776_v7 }
 0x11b   : > { %v1463_v37 = vmax.f32 %v1457_v31, 0.0 }
 0x11c   : > { %v1462_v38 = vmax.f32 %v1452_v35, 0.0  ;;  %2348 = vmatmul.mubr.msk.f32.vlgmr.msra.gmra.mrb[16].mxu1 %vm481_vm4, %v2792_v33  ;;  %2460 = vmatprep.subr.bf16.mxu1 %v2459_v34  ;;  %v2379_v39 = vpop.f32.mrb[24].mxu0 }
 0x11d   : > { %v1641_v40 = vadd.f32 %v2379_v39, %v2778_v8  ;;  %2462 = vmatpush3.bf16.msra.mxu1 %v2459_v34  ;;  %v1635_v41 = vpop.f32.mrb[25].mxu0  ;;  %2350 = vmatprep.mubr.msk.f32.mxu1 %vm481_vm4, %v2798_v36 }
 0x11e   : > { %v2463_v43 = vpack.c.bf16 %v1463_v37, %v1462_v38  ;;  %v1636_v44 = vadd.f32 %v1635_v41, %v2774_v0 }
 0x11f   : > { %v1655_v45 = vmax.f32 %v1641_v40, 0.0 }
 0x120   : > { %v1654_v46 = vmax.f32 %v1636_v44, 0.0  ;;  %2351 = vmatmul.mubr.msk.f32.gmra.mrb[18].mxu1 %vm481_vm4, %v2808_v42  ;;  %2464 = vmatprep.subr.bf16.mxu1 %v2463_v43  ;;  %v2382_v47 = vpop.f32.mrb[26].mxu0 }
 0x121   : > { %v1651_v48 = vadd.f32 %v2382_v47, %v2782_v14  ;;  %2466 = vmatpush3.bf16.msra.mxu1 %v2463_v43  ;;  %v1645_v49 = vpop.f32.mrb[27].mxu0  ;;  %2369 = vmatprep.mubr.msk.f32.mxu1 %vm481_vm4, %v2768_v6 }
 0x122   : > { %v2467_v50 = vpack.c.bf16 %v1655_v45, %v1654_v46  ;;  %v1646_v51 = vadd.f32 %v1645_v49, %v2776_v7 }
 0x123   : > { %v1657_v52 = vmax.f32 %v1651_v48, 0.0 }
 0x124   : > { %v1656_v53 = vmax.f32 %v1646_v51, 0.0  ;;  %2370 = vmatmul.mubr.msk.f32.vlgmr.msra.gmra.mrb[20].mxu1 %vm481_vm4, %v2792_v33  ;;  %2468 = vmatprep.subr.bf16.mxu1 %v2467_v50  ;;  %v2401_v54 = vpop.f32.mrb[28].mxu0 }
 0x125   : > { %v1835_v55 = vadd.f32 %v2401_v54, %v2778_v8  ;;  %2470 = vmatpush3.bf16.msra.mxu1 %v2467_v50  ;;  %v1829_v56 = vpop.f32.mrb[29].mxu0  ;;  %2372 = vmatprep.mubr.msk.f32.mxu1 %vm481_vm4, %v2798_v36 }
 0x126   : > { %v2471_v57 = vpack.c.bf16 %v1657_v52, %v1656_v53  ;;  %v1830_v58 = vadd.f32 %v1829_v56, %v2774_v0 }
 0x127   : > { %v1849_v59 = vmax.f32 %v1835_v55, 0.0 }
 0x128   : > { %v1848_v60 = vmax.f32 %v1830_v58, 0.0  ;;  %2373 = vmatmul.mubr.msk.f32.gmra.mrb[22].mxu1 %vm481_vm4, %v2808_v42  ;;  %2472 = vmatprep.subr.bf16.mxu1 %v2471_v57  ;;  %v2404_v61 = vpop.f32.mrb[30].mxu0 }
 0x129   : > { %v1845_v62 = vadd.f32 %v2404_v61, %v2782_v14  ;;  %2474 = vmatpush3.bf16.msra.mxu1 %v2471_v57  ;;  %v1839_v63 = vpop.f32.mrb[31].mxu0  ;;  %2391 = vmatprep.mubr.msk.f32.mxu1 %vm481_vm4, %v2768_v6  ;;  %v2889_v6 = vpop.permute.xlu1 %468 }
 0x12a   : > { %v2475_v8 = vpack.c.bf16 %v1849_v59, %v1848_v60  ;;  %v1840_v1 = vadd.f32 %v1839_v63, %v2776_v7  ;;  %v2891_v14 = vpop.permute.xlu0 %463 }
 0x12b   : > { %v1851_v2 = vmax.f32 %v1845_v62, 0.0 }
 0x12c   : > { %v1850_v3 = vmax.f32 %v1840_v1, 0.0  ;;  %2392 = vmatmul.mubr.msk.f32.vlgmr.msra.gmra.mrb[24].mxu1 %vm481_vm4, %v2792_v33  ;;  %2476 = vmatprep.subr.bf16.mxu0 %v2475_v8 }
 0x12d   : > { %2483 = vmatprep.subr.bf16.mxu1 %v2475_v8  ;;  %2478 = vmatpush3.bf16.msra.mxu0 %v2475_v8  ;;  %v2895_v12 = vpop.permute.xlu1 %478 }
 0x12e   : > { %v2479_v0 = vpack.c.bf16 %v1851_v2, %v1850_v3  ;;  %2485 = vmatpush3.bf16.msra.mxu1 %v2475_v8  ;;  %2394 = vmatprep.mubr.msk.f32.mxu1 %vm481_vm4, %v2798_v36 }
 0x130   : > { %2395 = vmatmul.mubr.msk.f32.gmra.mrb[26].mxu1 %vm481_vm4, %v2808_v42  ;;  %2480 = vmatprep.subr.bf16.mxu0 %v2479_v0 }
 0x131   : > { %2484 = vmatprep.subr.bf16.mxu1 %v2479_v0  ;;  %2482 = vmatpush3.bf16.msra.mxu0 %v2479_v0 }
 0x132   : > { %2486 = vmatpush3.bf16.msra.mxu1 %v2479_v0  ;;  %2416 = vmatprep.mubr.msk.f32.mxu1 %vm481_vm4, %v2798_v36  ;;  %v2897_v36 = vpop.permute.xlu0 %473 }
 0x134   : > { %2414 = vmatmul.mubr.msk.f32.vlgmr.msra.gmra.mrb[32].mxu0 %vm481_vm4, %v2792_v33 }
 0x135   : > { %2417 = vmatmul.mubr.msk.f32.vlgmr.msra.gmra.mrb[28].mxu1 %vm481_vm4, %v2808_v42 }
 0x1cf   : > { %v2261_v7 = vpop.f32.mrb[0].mxu1 }
 0x1d0   : > { %v560_v4 = vpop.f32.mrb[1].mxu1  ;;  %v566_v5 = vadd.f32 %v2261_v7, %v2889_v6 }
 0x1d1   : > { %v561_v9 = vadd.f32 %v560_v4, %v2891_v14 }
 0x1d2   : > { %v580_v33 = vmax.f32 %v566_v5, 0.0 }
 0x1d3   : > { %v2264_v10 = vpop.f32.mrb[2].mxu1  ;;  %v579_v42 = vmax.f32 %v561_v9, 0.0 }
 0x1d4   : > { %v570_v11 = vpop.f32.mrb[3].mxu1  ;;  %v576_v13 = vadd.f32 %v2264_v10, %v2895_v12  ;;  %v584_v20 = vmax.f32 %v580_v33, 0.0 }
 0x1d5   : > { %v571_v15 = vadd.f32 %v570_v11, %v2897_v36  ;;  %v583_v23 = vmax.f32 %v579_v42, 0.0 }
 0x1d6   : > { %v582_v21 = vmax.f32 %v576_v13, 0.0 }
 0x1d7   : > { %v2283_v16 = vpop.f32.mrb[4].mxu1  ;;  %v581_v24 = vmax.f32 %v571_v15, 0.0 }
 0x1d8   : > { %v760_v17 = vadd.f32 %v2283_v16, %v2889_v6  ;;  %v754_v18 = vpop.f32.mrb[5].mxu1  ;;  %v586_v32 = vmax.f32 %v582_v21, 0.0 }
 0x1d9   : > { %v755_v19 = vadd.f32 %v754_v18, %v2891_v14  ;;  %v585_v35 = vmax.f32 %v581_v24, 0.0 }
 0x1da   : > { %v774_v22 = vmax.f32 %v760_v17, 0.0 }
 0x1db   : > { %v773_v25 = vmax.f32 %v755_v19, 0.0  ;;  %v2286_v26 = vpop.f32.mrb[6].mxu1 }
 0x1dc   : > { %v778_v27 = vmax.f32 %v584_v20, %v774_v22  ;;  %v770_v28 = vadd.f32 %v2286_v26, %v2895_v12  ;;  %v764_v29 = vpop.f32.mrb[7].mxu1 }
 0x1dd   : > { %v777_v30 = vmax.f32 %v583_v23, %v773_v25  ;;  %v765_v31 = vadd.f32 %v764_v29, %v2897_v36 }
 0x1de   : > { %v776_v34 = vmax.f32 %v770_v28, 0.0 }
 0x1df   : > { %v775_v37 = vmax.f32 %v765_v31, 0.0  ;;  %v2305_v38 = vpop.f32.mrb[8].mxu1 }
 0x1e0   : > { %v780_v39 = vmax.f32 %v586_v32, %v776_v34  ;;  %v954_v40 = vadd.f32 %v2305_v38, %v2889_v6  ;;  %v948_v41 = vpop.f32.mrb[9].mxu1 }
 0x1e1   : > { %v779_v43 = vmax.f32 %v585_v35, %v775_v37  ;;  %v949_v44 = vadd.f32 %v948_v41, %v2891_v14 }
 0x1e2   : > { %v968_v45 = vmax.f32 %v954_v40, 0.0 }
 0x1e3   : > { %v967_v46 = vmax.f32 %v949_v44, 0.0  ;;  %v2308_v47 = vpop.f32.mrb[10].mxu1 }
 0x1e4   : > { %v972_v48 = vmax.f32 %v778_v27, %v968_v45  ;;  %v964_v49 = vadd.f32 %v2308_v47, %v2895_v12  ;;  %v958_v50 = vpop.f32.mrb[11].mxu1 }
 0x1e5   : > { %v971_v51 = vmax.f32 %v777_v30, %v967_v46  ;;  %v959_v52 = vadd.f32 %v958_v50, %v2897_v36 }
 0x1e6   : > { %v970_v53 = vmax.f32 %v964_v49, 0.0 }
 0x1e7   : > { %v969_v54 = vmax.f32 %v959_v52, 0.0  ;;  %v2327_v55 = vpop.f32.mrb[12].mxu1 }
 0x1e8   : > { %v974_v56 = vmax.f32 %v780_v39, %v970_v53  ;;  %v1148_v57 = vadd.f32 %v2327_v55, %v2889_v6  ;;  %v1142_v58 = vpop.f32.mrb[13].mxu1 }
 0x1e9   : > { %v973_v59 = vmax.f32 %v779_v43, %v969_v54  ;;  %v1143_v60 = vadd.f32 %v1142_v58, %v2891_v14 }
 0x1ea   : > { %v1162_v61 = vmax.f32 %v1148_v57, 0.0 }
 0x1eb   : > { %v1161_v62 = vmax.f32 %v1143_v60, 0.0  ;;  %v2330_v63 = vpop.f32.mrb[14].mxu1 }
 0x1ec   : > { %v1166_v8 = vmax.f32 %v972_v48, %v1162_v61  ;;  %v1158_v1 = vadd.f32 %v2330_v63, %v2895_v12  ;;  %v1152_v2 = vpop.f32.mrb[15].mxu1 }
 0x1ed   : > { %v1165_v3 = vmax.f32 %v971_v51, %v1161_v62  ;;  %v1153_v0 = vadd.f32 %v1152_v2, %v2897_v36 }
 0x1ee   : > { %v1164_v7 = vmax.f32 %v1158_v1, 0.0 }
 0x1ef   : > { %v1163_v4 = vmax.f32 %v1153_v0, 0.0  ;;  %v2349_v5 = vpop.f32.mrb[16].mxu1 }
 0x1f0   : > { %v1168_v9 = vmax.f32 %v974_v56, %v1164_v7  ;;  %v1342_v10 = vadd.f32 %v2349_v5, %v2889_v6  ;;  %v1336_v11 = vpop.f32.mrb[17].mxu1 }
 0x1f1   : > { %v1167_v33 = vmax.f32 %v973_v59, %v1163_v4  ;;  %v1337_v13 = vadd.f32 %v1336_v11, %v2891_v14  ;;  %v2135_v4 = vld [vmem:[%s299_s19] ss:$0 sm:$0xff] }
 0x1f2   : > { %v1356_v42 = vmax.f32 %v1342_v10, 0.0 }
 0x1f3   : > { %v1355_v15 = vmax.f32 %v1337_v13, 0.0  ;;  %v2352_v16 = vpop.f32.mrb[18].mxu1 }
 0x1f4   : > { %v1360_v17 = vmax.f32 %v1166_v8, %v1356_v42  ;;  %v1352_v18 = vadd.f32 %v2352_v16, %v2895_v12  ;;  %v1346_v19 = vpop.f32.mrb[19].mxu1 }
 0x1f5   : > { %v1359_v20 = vmax.f32 %v1165_v3, %v1355_v15  ;;  %v1347_v21 = vadd.f32 %v1346_v19, %v2897_v36 }
 0x1f6   : > { %v1358_v22 = vmax.f32 %v1352_v18, 0.0 }
 0x1f7   : > { %v1357_v23 = vmax.f32 %v1347_v21, 0.0  ;;  %v2371_v24 = vpop.f32.mrb[20].mxu1 }
 0x1f8   : > { %v1362_v25 = vmax.f32 %v1168_v9, %v1358_v22  ;;  %v1536_v26 = vadd.f32 %v2371_v24, %v2889_v6  ;;  %v1530_v27 = vpop.f32.mrb[21].mxu1 }
 0x1f9   : > { %v1361_v28 = vmax.f32 %v1167_v33, %v1357_v23  ;;  %v1531_v29 = vadd.f32 %v1530_v27, %v2891_v14 }
 0x1fa   : > { %v1550_v30 = vmax.f32 %v1536_v26, 0.0 }
 0x1fb   : > { %v1549_v31 = vmax.f32 %v1531_v29, 0.0  ;;  %v2374_v32 = vpop.f32.mrb[22].mxu1 }
 0x1fc   : > { %v1554_v34 = vmax.f32 %v1360_v17, %v1550_v30  ;;  %v1546_v35 = vadd.f32 %v2374_v32, %v2895_v12  ;;  %v1540_v37 = vpop.f32.mrb[23].mxu1 }
 0x1fd   : > { %v1553_v38 = vmax.f32 %v1359_v20, %v1549_v31  ;;  %v1541_v39 = vadd.f32 %v1540_v37, %v2897_v36 }
 0x1fe   : > { %v1552_v40 = vmax.f32 %v1546_v35, 0.0 }
 0x1ff   : > { %v1551_v41 = vmax.f32 %v1541_v39, 0.0  ;;  %v2393_v43 = vpop.f32.mrb[24].mxu1 }
 0x200   : > { %v1556_v44 = vmax.f32 %v1362_v25, %v1552_v40  ;;  %v1730_v45 = vadd.f32 %v2393_v43, %v2889_v6  ;;  %v1724_v46 = vpop.f32.mrb[25].mxu1 }
 0x201   : > { %v1555_v47 = vmax.f32 %v1361_v28, %v1551_v41  ;;  %v1725_v48 = vadd.f32 %v1724_v46, %v2891_v14 }
 0x202   : > { %v1744_v49 = vmax.f32 %v1730_v45, 0.0 }
 0x203   : > { %v1743_v50 = vmax.f32 %v1725_v48, 0.0  ;;  %v2396_v51 = vpop.f32.mrb[26].mxu1 }
 0x204   : > { %v1748_v52 = vmax.f32 %v1554_v34, %v1744_v49  ;;  %v1740_v53 = vadd.f32 %v2396_v51, %v2895_v12  ;;  %v1734_v54 = vpop.f32.mrb[27].mxu1 }
 0x205   : > { %v1747_v55 = vmax.f32 %v1553_v38, %v1743_v50  ;;  %v1735_v56 = vadd.f32 %v1734_v54, %v2897_v36 }
 0x206   : > { %v1746_v57 = vmax.f32 %v1740_v53, 0.0 }
 0x207   : > { %v1745_v58 = vmax.f32 %v1735_v56, 0.0  ;;  %v2415_v59 = vpop.f32.mrb[32].mxu0 }
 0x208   : > { %v1750_v60 = vmax.f32 %v1556_v44, %v1746_v57  ;;  %v1924_v61 = vadd.f32 %v2415_v59, %v2889_v6  ;;  %v2418_v62 = vpop.f32.mrb[28].mxu1  ;;  %v1918_v63 = vpop.f32.mrb[33].mxu0 }
 0x209   : > { %v1749_v8 = vmax.f32 %v1555_v47, %v1745_v58  ;;  %v1934_v1 = vadd.f32 %v2418_v62, %v2895_v12  ;;  %v1919_v2 = vadd.f32 %v1918_v63, %v2891_v14  ;;  %v1928_v3 = vpop.f32.mrb[29].mxu1 }
 0x20a   : > { %v1938_v0 = vmax.f32 %v1924_v61, 0.0  ;;  %v1929_v7 = vadd.f32 %v1928_v3, %v2897_v36 }
 0x20b   : > { %v1940_v5 = vmax.f32 %v1934_v1, 0.0  ;;  %v1937_v9 = vmax.f32 %v1919_v2, 0.0 }
 0x20c   : > { %v1942_v10 = vmax.f32 %v1748_v52, %v1938_v0  ;;  %v1939_v11 = vmax.f32 %v1929_v7, 0.0 }
 0x20d   : > { %v1944_v6 = vmax.f32 %v1750_v60, %v1940_v5  ;;  %v1941_v33 = vmax.f32 %v1747_v55, %v1937_v9 }
 0x20e   : > { %v1953_v13 = vmul.f32 %v2135_v4, %v1942_v10  ;;  %v1943_v12 = vmax.f32 %v1749_v8, %v1939_v11 }
 0x20f   : > { %v1955_v42 = vmul.f32 %v2135_v4, %v1944_v6  ;;  %v1952_v14 = vmul.f32 %v2135_v4, %v1941_v33 }
 0x210   : > { %1957 = vst [vmem:[%s307_s27 + $0x8] sm:$0xff] %v1953_v13  ;;  %v1954_v15 = vmul.f32 %v2135_v4, %v1943_v12 }
 0x211   : > { %1959 = vst [vmem:[%s307_s27 + $0x18] sm:$0xff] %v1955_v42  ;;  %1956 = vst [vmem:[%s307_s27] sm:$0xff] %v1952_v14 }
 0x212   : > { %1958 = vst [vmem:[%s307_s27 + $0x10] sm:$0xff] %v1954_v15 }
 0x213 PF: > { %s16_s23 = sadd.s32 1, %s2537_s23   ;;  %s2953_s21 = smov %s2533_s22 }
 0x214   : > { %p13_p5 = scmp.ge.s32.totalorder %s16_s23, 4   ;;  %s2954_s22 = smov %s2956_s24 }
 0x216   :  { %15 = sbr.rel (!%p13_p5) target bundleno = 2 (0x2), region = 77 }

</bundles_post_ra>
